<compile_context>
chip_gen: v5e
topology: v5e:2x2
jax: 0.10.0
libtpu: 0.0.40
codegen_flags: <defaults>
</compile_context>

<pallas_src>
import functools

import jax
import jax.numpy as jnp
from jax.experimental import pallas as pl
from jax.experimental.pallas import tpu as pltpu


_VMEM_LIMIT_BYTES = 48 << 20     # headroom under v7x's 64 MiB physical VMEM
_BLOCK_TARGET_BYTES = 4 << 20    # ~4 MiB per streamed block per stream


def _round_up(x, m):
    return ((x + m - 1) // m) * m


def _pick_tile_rows(n_rows, row_bytes):
    """Row tile size: ~4 MiB blocks, multiple of 8, and >=2 grid steps when
    possible (so the "parallel" grid axis can use both v7x TensorCores)."""
    if n_rows <= 8:
        return n_rows
    t = max(8, (_BLOCK_TARGET_BYTES // max(1, row_bytes)) // 8 * 8)
    t = min(t, _round_up(n_rows, 8))
    if pl.cdiv(n_rows, t) < 2:
        t = max(8, _round_up(pl.cdiv(n_rows, 2), 8))
    return t


# --------------------------- dropout keep-mask PRNG ---------------------------

def _keep_mask(row0, col0, n_rows, n_cols, row_stride, seed_u32, p):
    """Bernoulli(1-p) keep mask from a counter-based hash of the GLOBAL flat
    element index (tiling-independent, reproducible, plain jnp ops so it runs
    on TPU and in interpret mode).

    Uses the 2-multiply lowbias32 mixer: cheaper than 3-multiply murmur fmix32,
    which keeps the dropout kernel HBM-bound on v7x (VALU would bind otherwise).
    """
    rows = (jax.lax.broadcasted_iota(jnp.int32, (n_rows, n_cols), 0) + row0
            ).astype(jnp.uint32)
    cols = (jax.lax.broadcasted_iota(jnp.int32, (n_rows, n_cols), 1) + col0
            ).astype(jnp.uint32)
    if row_stride & (row_stride - 1) == 0:
        # strength-reduced: row * stride -> shift (stride is a power of two)
        idx = (rows << (row_stride.bit_length() - 1)) | cols
    else:
        idx = rows * jnp.uint32(row_stride) + cols   # u32 math: no int32 wrap
    h = idx ^ seed_u32
    h = h ^ (h >> 16)
    h = h * jnp.uint32(0x7FEB352D)
    h = h ^ (h >> 15)
    h = h * jnp.uint32(0x846CA68B)
    h = h ^ (h >> 16)
    threshold = jnp.uint32(min(int(round(p * (2 ** 32))), 2 ** 32 - 1))
    # TODO(synk): for bf16/fp8 activations, hash one 32-bit counter per 2/4
    # elements and split the bits to further cut u32 multiplies per element.
    return h >= threshold                            # P(keep) = 1 - p


# ------------------------------ LayerNorm kernel ------------------------------

def _layernorm_kernel(x_ref, alpha_ref, bias_ref, o_ref, *, eps, features):
    x = x_ref[...].astype(jnp.float32)               # (TM, F)
    # One-pass moments: sum(x), sum(x*x) -> unbiased (N-1) variance, matching
    # torch.Tensor.std.  Division is by (std + eps), like the torch module.
    s1 = jnp.sum(x, axis=-1, keepdims=True)
    s2 = jnp.sum(x * x, axis=-1, keepdims=True)
    mean = s1 * (1.0 / features)
    var = jnp.maximum(s2 - features * mean * mean, 0.0) * (1.0 / (features - 1))
    rstd = 1.0 / (jnp.sqrt(var) + eps)               # (TM, 1) per-row reciprocal
    y = alpha_ref[...].astype(jnp.float32) * ((x - mean) * rstd) \
        + bias_ref[...].astype(jnp.float32)
    o_ref[...] = y.astype(o_ref.dtype)


def layernorm(x2d, alpha, bias, *, eps):
    R, F = x2d.shape
    assert F > 1, "unbiased (N-1) std is undefined for features == 1"
    t = _pick_tile_rows(R, F * jnp.dtype(x2d.dtype).itemsize)
    return pl.pallas_call(
        functools.partial(_layernorm_kernel, eps=eps, features=F),
        out_shape=jax.ShapeDtypeStruct((R, F), x2d.dtype),
        grid_spec=pl.GridSpec(
            grid=(pl.cdiv(R, t),),                   # ragged last block is fine
            in_specs=[
                pl.BlockSpec((t, F), lambda i: (i, 0)),
                pl.BlockSpec((1, F), lambda i: (0, 0)),
                pl.BlockSpec((1, F), lambda i: (0, 0)),
            ],
            out_specs=pl.BlockSpec((t, F), lambda i: (i, 0)),
        ),
        compiler_params=pltpu.CompilerParams(
            dimension_semantics=("parallel",),
            vmem_limit_bytes=_VMEM_LIMIT_BYTES,
        ),
    )(x2d, alpha.reshape(1, F), bias.reshape(1, F))


# ------------------------ dropout + residual-add kernel ------------------------

def _residual_dropout_kernel(seed_ref, x_ref, y_ref, o_ref, *, p, width, tile_rows):
    x = x_ref[...].astype(jnp.float32)
    y = y_ref[...].astype(jnp.float32)
    if p > 0.0:
        row0 = pl.program_id(0) * tile_rows
        keep = _keep_mask(row0, 0, tile_rows, width, width,
                          seed_ref[0].astype(jnp.uint32), p)
        y = jnp.where(keep, y * (1.0 / (1.0 - p)), 0.0)   # keep-scale in f32
    o_ref[...] = (x + y).astype(o_ref.dtype)


def _residual_dropout_call(xr, yr, seed, *, p, tile_r, width):
    rows = xr.shape[0]
    kernel = functools.partial(_residual_dropout_kernel,
                               p=p, width=width, tile_rows=tile_r)
    return pl.pallas_call(
        kernel,
        out_shape=jax.ShapeDtypeStruct(xr.shape, xr.dtype),
        grid_spec=pltpu.PrefetchScalarGridSpec(
            num_scalar_prefetch=1,
            grid=(pl.cdiv(rows, tile_r),),
            in_specs=[
                pl.BlockSpec((tile_r, width), lambda i, s: (i, 0)),
                pl.BlockSpec((tile_r, width), lambda i, s: (i, 0)),
            ],
            out_specs=pl.BlockSpec((tile_r, width), lambda i, s: (i, 0)),
        ),
        compiler_params=pltpu.CompilerParams(
            dimension_semantics=("parallel",),
            vmem_limit_bytes=_VMEM_LIMIT_BYTES,
        ),
    )(jnp.asarray([seed], jnp.int32), xr, yr)


def residual_dropout_add(x2d, y2d, seed, *, p):
    R, F = x2d.shape
    if p >= 1.0:
        return x2d                               # everything dropped: out = x
    itemsize = jnp.dtype(x2d.dtype).itemsize
    if F % 128 == 0:
        # Normal transformer case: already lane-dense -> tile (R, F) directly,
        # no pad / reshape / slice HBM copies.
        tile_r = _pick_tile_rows(R, F * itemsize)
        return _residual_dropout_call(x2d, y2d, seed, p=p, tile_r=tile_r, width=F)
    # Fallback for small / odd F: flatten into lane-dense (rows, 512) slabs so
    # stores are unmasked vst; padding only triggers for tiny tensors.
    W = 512
    total = R * F
    rows = pl.cdiv(total, W)
    tile_r = _pick_tile_rows(rows, W * itemsize)
    padded_total = rows * W
    xf = x2d.reshape(-1)
    yf = y2d.reshape(-1)
    if padded_total != total:
        xf = jnp.pad(xf, (0, padded_total - total))
        yf = jnp.pad(yf, (0, padded_total - total))
    out = _residual_dropout_call(xf.reshape(rows, W), yf.reshape(rows, W), seed,
                                 p=p, tile_r=tile_r, width=W)
    if padded_total != total:
        return out.reshape(-1)[:total].reshape(R, F)
    return out.reshape(R, F)


# -------------- fused LN -> dense -> dropout + residual (one pass) --------------

def _fused_ln_dense_kernel(seed_ref, x_row_ref, w_ref, b_ref, alpha_ref, beta_ref,
                           x_res_ref, o_ref, *, eps, features, out_features, p,
                           tile_m, tile_n):
    x = x_row_ref[...].astype(jnp.float32)            # (tm, F) full feature rows
    s1 = jnp.sum(x, axis=-1, keepdims=True)
    s2 = jnp.sum(x * x, axis=-1, keepdims=True)
    mean = s1 * (1.0 / features)
    var = jnp.maximum(s2 - features * mean * mean, 0.0) * (1.0 / (features - 1))
    rstd = 1.0 / (jnp.sqrt(var) + eps)
    normed = alpha_ref[...].astype(jnp.float32) * ((x - mean) * rstd) \
        + beta_ref[...].astype(jnp.float32)
    y = jnp.dot(normed, w_ref[...].astype(jnp.float32),
                preferred_element_type=jnp.float32) \
        + b_ref[...].astype(jnp.float32)              # (tm, tn)
    if p > 0.0:
        row0 = pl.program_id(0) * tile_m
        col0 = pl.program_id(1) * tile_n
        keep = _keep_mask(row0, col0, tile_m, tile_n, out_features,
                          seed_ref[0].astype(jnp.uint32), p)
        y = jnp.where(keep, y * (1.0 / (1.0 - p)), 0.0)
    o_ref[...] = (x_res_ref[...].astype(jnp.float32) + y).astype(o_ref.dtype)


def fused_ln_dense_residual_dropout(x2d, W, b, alpha, beta, seed, *, eps, p):
    R, F = x2d.shape
    Fw, N = W.shape
    assert Fw == F and N == F, "residual connection needs a features->features sublayer"
    assert F > 1, "unbiased (N-1) std is undefined for features == 1"
    if p >= 1.0:
        return x2d
    itemsize = jnp.dtype(x2d.dtype).itemsize
    if F % 128 == 0:
        tn = min(F, 512)
        while tn > 128 and F * tn * itemsize > (8 << 20):
            tn -= 128
    else:
        tn = F                                        # single full-width N tile
    tm = min(_pick_tile_rows(R, F * itemsize), 512)
    # TODO(synk): K-tile the contraction (grid axis "arbitrary" + f32 VMEM
    # accumulator) for very large F where the (F, tn) weight tile won't fit VMEM.
    kernel = functools.partial(
        _fused_ln_dense_kernel, eps=eps, features=F, out_features=N, p=p,
        tile_m=tm, tile_n=tn)
    return pl.pallas_call(
        kernel,
        out_shape=jax.ShapeDtypeStruct((R, N), x2d.dtype),
        grid_spec=pltpu.PrefetchScalarGridSpec(
            num_scalar_prefetch=1,
            grid=(pl.cdiv(R, tm), pl.cdiv(N, tn)),
            in_specs=[
                pl.BlockSpec((tm, F), lambda i, j, s: (i, 0)),    # LN + matmul LHS
                pl.BlockSpec((F, tn), lambda i, j, s: (0, j)),    # dense weight
                pl.BlockSpec((1, tn), lambda i, j, s: (0, j)),    # dense bias
                pl.BlockSpec((1, F), lambda i, j, s: (0, 0)),     # LN alpha
                pl.BlockSpec((1, F), lambda i, j, s: (0, 0)),     # LN bias
                pl.BlockSpec((tm, tn), lambda i, j, s: (i, j)),   # residual x tile
            ],
            out_specs=pl.BlockSpec((tm, tn), lambda i, j, s: (i, j)),
        ),
        compiler_params=pltpu.CompilerParams(
            dimension_semantics=("parallel", "parallel"),
            vmem_limit_bytes=_VMEM_LIMIT_BYTES,
        ),
    )(jnp.asarray([seed], jnp.int32), x2d, W, b.reshape(1, N),
      alpha.reshape(1, F), beta.reshape(1, F), x2d)


# ------------------------------ module equivalent ------------------------------

class ResidualConnection:
    """JAX/Pallas equivalent of the PyTorch ResidualConnection module."""

    def __init__(self, features, dropout, eps=1e-6):
        self.features = int(features)
        self.p = float(dropout)
        self.eps = float(eps)
        # Deterministic init, matching nn.Parameter(torch.ones/zeros(features)).
        self.alpha = jnp.ones((features,), jnp.float32)
        self.bias = jnp.zeros((features,), jnp.float32)

    def __call__(self, x, sublayer, *, dropout_seed=0):
        """Generic path: arbitrary `sublayer` callable runs as plain JAX between
        the LayerNorm kernel and the dropout+residual kernel."""
        B, S, F = x.shape
        assert F == self.features
        x2d = x.reshape(B * S, F)
        normed = layernorm(x2d, self.alpha, self.bias, eps=self.eps)
        y = sublayer(normed.reshape(B, S, F)).reshape(B * S, F)
        out = residual_dropout_add(x2d, y, dropout_seed, p=self.p)
        return out.reshape(B, S, F)

    def call_dense(self, x, W, b, *, dropout_seed=0):
        """Fused path for a known dense sublayer (h @ W + b): one pallas_call
        with LN prologue, MXU matmul, dropout + residual epilogue (no HBM round
        trips for `normed` / `y`)."""
        B, S, F = x.shape
        assert F == self.features
        out = fused_ln_dense_residual_dropout(
            x.reshape(B * S, F), W, b, self.alpha, self.bias, dropout_seed,
            eps=self.eps, p=self.p)
        return out.reshape(B, S, F)


# ------------------------------------ main -------------------------------------

if __name__ == "__main__":
    B, S, F = 2, 8, 32            # batch, seq, features (small demo shapes)
    key = jax.random.PRNGKey(0)
    kx, kw, kb, kx2, kw2 = jax.random.split(key, 5)

    x = jax.random.normal(kx, (B, S, F), jnp.float32)
    Wm = jax.random.normal(kw, (F, F), jnp.float32) * 0.05
    bv = jax.random.normal(kb, (F,), jnp.float32) * 0.01
    sublayer = lambda h: jnp.einsum("bsf,fg->bsg", h, Wm) + bv

    def ref_forward(xin, alpha, bias, eps, sub):
        mean = jnp.mean(xin, axis=-1, keepdims=True)
        std = jnp.std(xin, axis=-1, keepdims=True, ddof=1)  # unbiased, like torch
        normed = alpha * (xin - mean) / (std + eps) + bias
        return xin + sub(normed)

    # 1) generic path, dropout = 0, vs pure-JAX reference
    rc0 = ResidualConnection(F, dropout=0.0)
    out0 = jax.block_until_ready(rc0(x, sublayer))
    ref = ref_forward(x, rc0.alpha, rc0.bias, rc0.eps, sublayer)
    assert jnp.allclose(out0, ref, atol=1e-4, rtol=1e-4), "generic path mismatch"

    # 2) fused dense path, dropout = 0 (looser tol: MXU vs XLA-default matmul precision)
    out_fused = jax.block_until_ready(rc0.call_dense(x, Wm, bv))
    assert jnp.allclose(out_fused, ref, atol=5e-3, rtol=5e-3), "fused path mismatch"

    # 3) generic path with dropout: every element is x (dropped) or x + y/(1-p) (kept)
    # TODO(synk): dropout RNG stream differs from torch's; only Bernoulli(1-p)
    # keep / 1/(1-p) scale semantics match.
    p = 0.1
    rc = ResidualConnection(F, dropout=p)
    out = jax.block_until_ready(rc(x, sublayer, dropout_seed=1234))
    assert out.shape == (B, S, F) and out.dtype == x.dtype
    mean_x = jnp.mean(x, axis=-1, keepdims=True)
    std_x = jnp.std(x, axis=-1, keepdims=True, ddof=1)
    normed_ref = rc.alpha * (x - mean_x) / (std_x + rc.eps) + rc.bias
    y_ref = sublayer(normed_ref)
    kept = x + y_ref / (1.0 - p)
    ok = jnp.isclose(out, x, atol=1e-4) | jnp.isclose(out, kept, atol=1e-4)
    assert bool(jnp.all(ok)), "generic dropout output not in {x, x + y/(1-p)}"

    # 4) fused dense path with dropout: same structural property
    out_fd = jax.block_until_ready(rc.call_dense(x, Wm, bv, dropout_seed=1234))
    ok2 = jnp.isclose(out_fd, x, atol=5e-3) | jnp.isclose(out_fd, kept, atol=5e-3)
    assert bool(jnp.all(ok2)), "fused dropout output not in {x, x + y/(1-p)}"

    # 5) lane-dense direct dropout path (F % 128 == 0) with a ragged row count
    B2, S2, F2 = 2, 9, 128
    x2 = jax.random.normal(kx2, (B2, S2, F2), jnp.float32)
    W2 = jax.random.normal(kw2, (F2, F2), jnp.float32) * 0.05
    sub2 = lambda h: jnp.einsum("bsf,fg->bsg", h, W2)
    rc2 = ResidualConnection(F2, dropout=0.0)
    out2 = jax.block_until_ready(rc2(x2, sub2))
    ref2 = ref_forward(x2, rc2.alpha, rc2.bias, rc2.eps, sub2)
    assert jnp.allclose(out2, ref2, atol=1e-4, rtol=1e-4), "lane-dense path mismatch"
    out2f = jax.block_until_ready(rc2.call_dense(x2, W2, jnp.zeros((F2,), jnp.float32)))
    assert jnp.allclose(out2f, ref2, atol=5e-3, rtol=5e-3), "fused lane-dense mismatch"

    print("KERNEL_OK")
</pallas_src>

<mosaic_0001>
module attributes {stable_mosaic.version = 11 : i64} {
  func.func @_layernorm_kernel(%arg0: i32, %arg1: memref<8x32xf32, #tpu.memory_space<vmem>>, %arg2: memref<1x32xf32, #tpu.memory_space<vmem>>, %arg3: memref<1x32xf32, #tpu.memory_space<vmem>>, %arg4: memref<8x32xf32, #tpu.memory_space<vmem>>) attributes {dimension_semantics = [#tpu.dimension_semantics<parallel>], iteration_bounds = array<i64: 2>, scalar_prefetch = 0 : i64, scratch_operands = 0 : i64, tpu.core_type = #tpu.core_type<tc>, window_params = [{transform_indices = @transform_0, window_bounds = array<i64: 8, 32>}, {pipeline_mode = #tpu.pipeline_mode<synchronous>, transform_indices = @transform_1, window_bounds = array<i64: 1, 32>}, {pipeline_mode = #tpu.pipeline_mode<synchronous>, transform_indices = @transform_2, window_bounds = array<i64: 1, 32>}, {transform_indices = @transform_3, window_bounds = array<i64: 8, 32>}]} {
    %c0 = arith.constant 0 : index
    %c0_0 = arith.constant 0 : index
    %0 = vector.load %arg1[%c0, %c0_0] : memref<8x32xf32, #tpu.memory_space<vmem>>, vector<8x32xf32>
    %cst = arith.constant dense<0.000000e+00> : vector<8xf32>
    %1 = vector.multi_reduction <add>, %0, %cst [1] : vector<8x32xf32> to vector<8xf32>
    %2 = vector.shape_cast %1 : vector<8xf32> to vector<8x1xf32>
    %3 = arith.mulf %0, %0 : vector<8x32xf32>
    %cst_1 = arith.constant dense<0.000000e+00> : vector<8xf32>
    %4 = vector.multi_reduction <add>, %3, %cst_1 [1] : vector<8x32xf32> to vector<8xf32>
    %5 = vector.shape_cast %4 : vector<8xf32> to vector<8x1xf32>
    %cst_2 = arith.constant 3.125000e-02 : f32
    %6 = vector.broadcast %cst_2 : f32 to vector<8x1xf32>
    %7 = arith.mulf %2, %6 : vector<8x1xf32>
    %cst_3 = arith.constant 3.200000e+01 : f32
    %8 = vector.broadcast %cst_3 : f32 to vector<8x1xf32>
    %9 = arith.mulf %8, %7 : vector<8x1xf32>
    %10 = arith.mulf %9, %7 : vector<8x1xf32>
    %11 = arith.subf %5, %10 : vector<8x1xf32>
    %cst_4 = arith.constant 0.000000e+00 : f32
    %12 = vector.broadcast %cst_4 : f32 to vector<8x1xf32>
    %13 = arith.maximumf %11, %12 : vector<8x1xf32>
    %cst_5 = arith.constant 0.0322580636 : f32
    %14 = vector.broadcast %cst_5 : f32 to vector<8x1xf32>
    %15 = arith.mulf %13, %14 : vector<8x1xf32>
    %16 = math.sqrt %15 : vector<8x1xf32>
    %cst_6 = arith.constant 9.99999997E-7 : f32
    %17 = vector.broadcast %cst_6 : f32 to vector<8x1xf32>
    %18 = arith.addf %16, %17 : vector<8x1xf32>
    %cst_7 = arith.constant 1.000000e+00 : f32
    %19 = vector.broadcast %cst_7 : f32 to vector<8x1xf32>
    %20 = arith.divf %19, %18 : vector<8x1xf32>
    %c0_8 = arith.constant 0 : index
    %c0_9 = arith.constant 0 : index
    %21 = vector.load %arg2[%c0_8, %c0_9] : memref<1x32xf32, #tpu.memory_space<vmem>>, vector<1x32xf32>
    %22 = vector.broadcast %7 : vector<8x1xf32> to vector<8x32xf32>
    %23 = arith.subf %0, %22 : vector<8x32xf32>
    %24 = vector.broadcast %20 : vector<8x1xf32> to vector<8x32xf32>
    %25 = arith.mulf %23, %24 : vector<8x32xf32>
    %26 = vector.broadcast %21 : vector<1x32xf32> to vector<8x32xf32>
    %27 = arith.mulf %26, %25 : vector<8x32xf32>
    %c0_10 = arith.constant 0 : index
    %c0_11 = arith.constant 0 : index
    %28 = vector.load %arg3[%c0_10, %c0_11] : memref<1x32xf32, #tpu.memory_space<vmem>>, vector<1x32xf32>
    %29 = vector.broadcast %28 : vector<1x32xf32> to vector<8x32xf32>
    %30 = arith.addf %27, %29 : vector<8x32xf32>
    %c0_12 = arith.constant 0 : index
    %c0_13 = arith.constant 0 : index
    %31 = vector.load %arg4[%c0_12, %c0_13] : memref<8x32xf32, #tpu.memory_space<vmem>>, vector<8x32xf32>
    tpu.vector_store %arg4[%c0_12, %c0_13], %30 {strides = array<i32>} : memref<8x32xf32, #tpu.memory_space<vmem>>, vector<8x32xf32>,
    return
  }
  func.func @transform_0(%arg0: i32) -> (i32, i32) {
    %c0_i32 = arith.constant 0 : i32
    %c0_i32_0 = arith.constant 0 : i32
    return %arg0, %c0_i32 : i32, i32
  }
  func.func @transform_1(%arg0: i32) -> (i32, i32) {
    %c0_i32 = arith.constant 0 : i32
    %c0_i32_0 = arith.constant 0 : i32
    %c0_i32_1 = arith.constant 0 : i32
    return %c0_i32, %c0_i32_0 : i32, i32
  }
  func.func @transform_2(%arg0: i32) -> (i32, i32) {
    %c0_i32 = arith.constant 0 : i32
    %c0_i32_0 = arith.constant 0 : i32
    %c0_i32_1 = arith.constant 0 : i32
    return %c0_i32, %c0_i32_0 : i32, i32
  }
  func.func @transform_3(%arg0: i32) -> (i32, i32) {
    %c0_i32 = arith.constant 0 : i32
    %c0_i32_0 = arith.constant 0 : i32
    return %arg0, %c0_i32 : i32, i32
  }
}

</mosaic_0001>

<bundles_post_ra>
// kernel: tpu_custom_call.1
= control target key start
LH: loop header
LB: loop body
LE: loop exit
PB: predicated region body
PF: predicated region fallthrough
CT: control target
= control target key end

     0   :  { %8 = vsyncpa [#allocation3], 0  ;;  %s733_s0 = inlined_call_operand.hbm [shape: f32[16,32], index: 0, kind: input, shape index: {}]   ;;  %s734_s1 = inlined_call_operand.hbm [shape: f32[1,32], index: 1, kind: input, shape index: {}]   ;;  %s735_s2 = inlined_call_operand.vmem [shape: f32[1,32], index: 2, kind: input, shape index: {}]   ;;  %s736_s3 = inlined_call_operand.hbm [shape: f32[16,32], index: 3, kind: output, shape index: {}]  }
   0x1   :  { %10 = vsyncpa [#allocation3 + $0x1], 0 }
   0x2   :  { %11 = vsyncpa [#allocation6], 0 }
   0x3   :  { %12 = vsyncpa [#allocation4], 0 }
   0x4   :  { %14 = vsyncpa [#allocation4 + $0x1], 0  ;;  %s585_s12 = smov 0   ;;  %s587_s13 = smov 0  }
   0x5   :  { %s589_s14 = smov 0   ;;  %s591_s15 = smov 0  }
   0x6 LB: > { %s606_s16 = sadd.s32 4294967295, %s562_s15   ;;  %s355_s17 = sadd.s32 4294967294, %s562_s15   ;;  %s562_s15 = sphi %s591_s15, %s746_s15   ;;  %s558_s14 = sphi %s589_s14, %s745_s14   ;;  %s554_s13 = sphi %s587_s13, %s744_s13   ;;  %s550_s12 = sphi %s585_s12, %s743_s12  }
   0x7   : > { %p40_p0 = scmp.ne.s32.totalorder %s554_s13, %s550_s12  ;;  %p41_p1 = scmp.eq.s32.totalorder %s606_s16, 0 }
   0x8   : > { %p106_p2 = scmp.eq.s32.totalorder %s606_s16, 1  ;;  %p112_p3 = scmp.eq.s32.totalorder %s355_s17, 1 }
   0x9   : > { %p615_p4 = por %p41_p1, %p40_p0  ;;  %p356_p5 = scmp.ge.s32.totalorder %s562_s15, 1 }
   0xa   : > { %p620_p6 = por %p112_p3, %p40_p0  ;;  %p119_p7 = scmp.lt.s32.totalorder %s562_s15, 3 }
   0xb   : > { %s131_s22 = sshll.u32 %s734_s1, 4  ;;  %s564_s24 = smov [#allocation5]   ;;  %s132_s22 = int_to_ptr.hbm [resolvable:$true] %s131_s22 }
   0xc   : > { %p628_p8 = pnand %p356_p5, %p119_p7  ;;  %s133_s25 = sshll.u32 %s564_s24, 4  ;;  %s134_s25 = int_to_ptr.vmem [resolvable:$true] %s133_s25 }
   0xd   : > { %s638_s26 = sadd.s32 1, %s562_s15   ;;  %s27_s27 = sadd.s32 1, %s558_s14 }
   0xe   : > { %p377_p10 = pneg %p628_p8  ;;  %s24_s28 = ssub.s32 %s562_s15, %s638_s26 }
   0xf   : > { %p25_p12 = scmp.eq.s32.totalorder %s24_s28, 0  ;;  %p34_p13 = scmp.ne.s32.totalorder %s558_s14, %s554_s13 }
  0x10   : > { %p378_p11 = pnand %p377_p10, %p41_p1  ;;  %p35_p0 = scmp.eq.s32.totalorder %s562_s15, 0 }
  0x11   : > { %s647_s29 = scalar_select %p25_p12, %s558_s14, %s27_s27  }
  0x12   : > { %380 = dma.hbm_to_vmem [thread:$0]  (!%p378_p11), %s132_s22, 16, %s134_s25, [#allocation6]  }
  0x13   : > { %p651_p3 = por %p106_p2, %p34_p13  ;;  %p390_p5 = scmp.lt.s32.totalorder %s562_s15, 2 }
  0x14   : > { %s147_s4 = sand.u32 1, %s558_s14   ;;  %s360_s5 = sshll.u32 %s562_s15, 3 }
  0x15   : > { %p36_p7 = por %p35_p0, %p34_p13  ;;  %s359_s6 = sshll.u32 %s147_s4, 3 }
  0x16   : > { %s155_s9 = scalar_lea.hbm %s733_s0, %s360_s5  ;;  %s151_s11 = scalar_lea.vmem [#allocation2], %s359_s6 }
  0x17   : > { %s157_s10 = sshll.u32 %s155_s9, 4  ;;  %s159_s17 = sshll.u32 %s151_s11, 4  ;;  %s158_s10 = int_to_ptr.hbm [resolvable:$true] %s157_s10  ;;  %s160_s17 = int_to_ptr.vmem [resolvable:$true] %s159_s17 }
  0x18   : > { %p661_p10 = pnand %p390_p5, %p36_p7  ;;  %s148_s21 = scalar_lea.sflag [#allocation3], %s147_s4 }
  0x19   : > { %s462_s22 = sshra.s32 %s158_s10, 4  ;;  %s469_s28 = scalar_lea.hbm %s733_s0, 16  ;;  %s463_s22 = int_to_ptr.hbm [resolvable:$true] %s462_s22 }
  0x1a   : > { %s464_s24 = scalar_lea.hbm %s463_s22, 8  ;;  %p466_p11 = pneg %p661_p10 }
  0x1b   : > { %p465_p2 = scmp.ne.s32.totalorder %s463_s22, %s464_s24  ;;  %p470_p0 = scmp.lt.s32.totalorder %s463_s22, %s733_s0 }
  0x1c   : > { %p471_p5 = scmp.lt.s32.totalorder %s469_s28, %s464_s24 }
  0x1d   : > { %p467_p12 = pnand %p466_p11, %p465_p2 }
  0x1e   : > { %p472_p7 = por %p471_p5, %p470_p0 }
  0x1f   : > { %p468_p13 = pneg %p467_p12 }
  0x21   : > { %p473_p9 = pnand %p472_p7, %p468_p13 }
  0x23   : > { %476 = shalt.err (!%p473_p9)
}
  0x24   : > { %384 = dma.hbm_to_vmem [thread:$0]  (!%p661_p10), %s158_s10, 128, %s160_s17, %s148_s21  }
  0x25   : > { %168 = sbr.rel (%p628_p8) target bundleno = 226 (0xe2), region = 32  ;;  %s678_s4 = sand.u32 (!%p628_p8), 1, %s554_s13  }
  0x26   : > { %s362_s7 = sshll.u32 (!%p628_p8), %s678_s4, 3  ;;  %s171_s8 = scalar_lea.sflag (!%p628_p8), [#allocation3], %s678_s4 }
  0x27   : > { %s174_s9 = scalar_lea.vmem (!%p628_p8), [#allocation2], %s362_s7 }
  0x2a   : > { %537 = dma.done.wait (%p615_p4), %s171_s8, 128  }
  0x2b   : > { %539 = vsyncadd (%p615_p4), %s171_s8, 4294967168 }
  0x2c   : > { %541 = dma.done.wait (%p41_p1), [#allocation6], 16  }
  0x2d   : > { %543 = vsyncadd (%p41_p1), [#allocation6], 4294967280  ;;  %vm204_vm0 = vcmask 261120   ;;  %v203_v0 = vld [vmem:[%s174_s9] sm:$0xff]  ;;  %s366_s18 = sshll.u32 %s606_s16, 3  ;;  %s202_s16 = scalar_lea.vmem [#allocation7], %s362_s7 }
  0x2e   : > { %v205_v1 = vsel %vm204_vm0, %v203_v0, 0.0  ;;  %v208_v2 = vmul.f32 %v203_v0, %v203_v0  ;;  %v426_v33 = vld [vmem:[#allocation5] ss:$0 sm:$0xff]  ;;  %s270_s11 = scalar_lea.hbm %s736_s3, %s366_s18  ;;  %v427_v36 = vld [vmem:[%s735_s2] ss:$0 sm:$0xff]  ;;  %s272_s21 = sshll.u32 %s202_s16, 4  ;;  %s273_s21 = int_to_ptr.vmem [resolvable:$true] %s272_s21 }
  0x2f   : > { %206 = vadd.xlane.f32.xlu0 %v205_v1  ;;  %s274_s22 = sshll.u32 %s270_s11, 4  ;;  %s260_s24 = scalar_lea.sflag [#allocation4], %s678_s4  ;;  %s275_s22 = int_to_ptr.hbm [resolvable:$true] %s274_s22 }
  0x30   : > { %v209_v3 = vsel %vm204_vm0, %v208_v2, 0.0  ;;  %s506_s25 = sshra.s32 %s275_s22, 4  ;;  %s512_s6 = scalar_lea.hbm %s736_s3, 16  ;;  %s507_s25 = int_to_ptr.hbm [resolvable:$true] %s506_s25 }
  0x31   : > { %s508_s27 = scalar_lea.hbm %s507_s25, 8  ;;  %p513_p9 = scmp.lt.s32.totalorder %s507_s25, %s736_s3 }
  0x32   : > { %p509_p1 = scmp.ne.s32.totalorder %s507_s25, %s508_s27  ;;  %p514_p10 = scmp.lt.s32.totalorder %s512_s6, %s508_s27 }
  0x34   : > { %p510_p4 = pnand %p509_p1, %p651_p3  ;;  %p515_p2 = por %p514_p10, %p513_p9 }
  0x36   : > { %p511_p8 = pneg %p510_p4 }
  0x37   : > { %210 = vadd.xlane.f32.xlu0 %v209_v3 }
  0x38   : > { %p516_p11 = pnand %p515_p2, %p511_p8 }
  0xa2   : > { %v207_v4 = vpop.xlane.xlu0 %206 }
  0xa3   : > { %v212_v5 = vmul.f32 0.03125, %v207_v4 }
  0xa5   : > { %v213_v6 = vmul.f32 32.0, %v212_v5  ;;  %v247_v31 = vsub.f32 %v203_v0, %v212_v5 }
  0xa7   : > { %v214_v7 = vmul.f32 %v213_v6, %v212_v5 }
  0xaa   : > { %v211_v8 = vpop.xlane.xlu0 %210 }
  0xab   : > { %v215_v9 = vsub.f32 %v211_v8, %v214_v7 }
  0xad   : > { %v216_v10 = vmax.f32 %v215_v9, 0.0 }
  0xaf   : > { %v217_v11 = vmul.f32 0.032258064, %v216_v10 }
  0xb1   : > { %428 = vrsqrt.f32 %v217_v11  ;;  %vm225_vm1 = vcmp.eq.f32.partialorder %v217_v11, inf  ;;  %v228_v19 = vand.u32 2147483648, %v217_v11  ;;  %vm227_vm2 = vcmp.eq.f32.partialorder %v217_v11, 0.0 }
  0xb7   : > { %v429_v12 = vpop.eup %428 }
  0xb8   : > { %v219_v13 = vmul.f32 %v429_v12, %v217_v11 }
  0xba   : > { %v220_v14 = vmul.f32 %v429_v12, %v219_v13 }
  0xbc   : > { %v221_v15 = vmul.f32 0.5, %v220_v14 }
  0xbe   : > { %v222_v16 = vsub.f32 1.5, %v221_v15 }
  0xc0   : > { %v223_v17 = vmul.f32 %v429_v12, %v222_v16 }
  0xc2   : > { %v224_v18 = vmul.f32 %v223_v17, %v217_v11 }
  0xc4   : > { %v226_v20 = vsel %vm225_vm1, %v217_v11, %v224_v18 }
  0xc5   : > { %v229_v21 = vsel %vm227_vm2, %v228_v19, %v226_v20 }
  0xc6   : > { %v230_v22 = vadd.f32 1e-06, %v229_v21 }
  0xc8   : > { %430 = vrcp.f32 %v230_v22  ;;  %v242_v26 = vand.u32 2147483648, %v230_v22  ;;  %v240_v28 = vand.u32 2147483647, %v230_v22  ;;  %vm236_vm4 = vweird.f32 %v230_v22 }
  0xca   : > { %v243_v30 = vor.u32 1.1754944e-38, %v242_v26  ;;  %vm241_vm6 = vcmp.eq.f32.partialorder %v240_v28, 8.507059e+37 }
  0xce   : > { %v431_v23 = vpop.eup %430 }
  0xcf   : > { %v232_v24 = vmul.f32 %v431_v23, %v230_v22  ;;  %vm237_vm3 = vweird.f32 %v431_v23 }
  0xd0   : > { %vm238_vm5 = vmor %vm236_vm4, %vm237_vm3 }
  0xd1   : > { %v233_v25 = vsub.f32 1.0, %v232_v24 }
  0xd3   : > { %v234_v27 = vmul.f32 %v431_v23, %v233_v25 }
  0xd5   : > { %v235_v29 = vadd.f32 %v431_v23, %v234_v27 }
  0xd7   : > { %v239_v32 = vsel %vm238_vm5, %v431_v23, %v235_v29 }
  0xd8   : > { %v244_v34 = vsel %vm241_vm6, %v243_v30, %v239_v32 }
  0xd9   : > { %v248_v35 = vmul.f32 %v247_v31, %v244_v34 }
  0xdb   : > { %v252_v37 = vmul.f32 %v426_v33, %v248_v35 }
  0xdd   : > { %v257_v38 = vadd.f32 %v427_v36, %v252_v37 }
  0xdf   : > { %258 = vst.msk [vmem:[%s202_s16] sm:$0xff] %vm204_vm0, %v257_v38 }
  0xe0   : > { %519 = shalt.err (!%p516_p11)
}
  0xe1   : > { %375 = dma.vmem_to_hbm [thread:$0]  (%p651_p3), %s273_s21, 128, %s275_s22, %s260_s24  }
  0xe2 PF: > { %s286_s4 = sand.u32 1, %s550_s12   ;;  %p742_p12 = scmp.ge.s32.totalorder %s562_s15, 2 }
  0xe3   : > { %s287_s9 = scalar_lea.sflag [#allocation4], %s286_s4 }
  0xe4   : > { %p386_p13 = pnand %p742_p12, %p620_p6 }
  0xe6   : > { %p387_p0 = pneg %p386_p13 }
  0xe8   : > { %545 = dma.done.wait (%p387_p0), %s287_s9, 128  }
  0xe9   : > { %547 = vsyncadd (%p387_p0), %s287_s9, 4294967168  ;;  %p17_p5 = scmp.ge.s32.totalorder %s638_s26, 4   ;;  %s743_s12 = smov %s554_s13 }
  0xea   : > { %s744_s13 = smov %s558_s14  ;;  %s745_s14 = smov %s647_s29 }
  0xeb   : > { %s746_s15 = smov %s638_s26  ;;  %19 = sbr.rel (!%p17_p5) target bundleno = 6 (0x6), region = 81 }
  0xf0   :  { %293 = vsyncpa [#allocation3], 1 }
  0xf1   :  { %295 = vsyncpa [#allocation3 + $0x1], 1 }
  0xf2   :  { %296 = vsyncpa [#allocation6], 1 }
  0xf3   :  { %297 = vsyncpa [#allocation4], 1 }
  0xf4   :  { %299 = vsyncpa [#allocation4 + $0x1], 1 }

</bundles_post_ra>
